<compile_context>
chip_gen: v6e
topology: v6e:2x2x1
jax: 0.10.0
libtpu: 0.0.40
codegen_flags: <defaults>
</compile_context>

<pallas_src>
import functools

import jax
import jax.numpy as jnp
from jax import lax
from jax.experimental import pallas as pl
from jax.experimental.pallas import tpu as pltpu

_LANE = 128
_SUBLANE = 8
_CHUNK_ROWS = 512          # rows per inner-loop iteration (256 KiB f32 temporaries)
_MAX_ROW_BLOCK = 4096      # rows per grid step: 2 MiB/input/buffer, 3 in x 2 buf = 12 MiB
_VMEM_LIMIT_BYTES = 32 * 1024 * 1024


def _vfl_kernel(pred_ref, gt_ref, label_ref, out_ref, *,
                alpha, gamma, row_block, chunk_rows, rows_valid, needs_mask):
    i = pl.program_id(0)
    n_chunks = row_block // chunk_rows  # static

    def chunk_body(c, acc):
        start = pl.multiple_of(c * chunk_rows, _SUBLANE)
        sl = pl.ds(start, chunk_rows)
        p = pred_ref[sl, :].astype(jnp.float32)
        g = gt_ref[sl, :].astype(jnp.float32)
        lbl = label_ref[sl, :].astype(jnp.float32)

        if needs_mask:
            # The last grid block overhangs the (rows_valid, 128) array; rows
            # beyond rows_valid hold unspecified data.  Select the INPUTS to
            # safe values before taking logs (garbage -> NaN otherwise):
            # (p,g,lbl)=(1,1,1) gives weight=1, bce=0 -> contribution 0.
            row_ids = lax.broadcasted_iota(jnp.int32, (chunk_rows, _LANE), 0)
            valid = (i * row_block + start + row_ids) < rows_valid
            one = jnp.float32(1.0)
            p = jnp.where(valid, p, one)
            g = jnp.where(valid, g, one)
            lbl = jnp.where(valid, lbl, one)

        # Raw (unclamped) log(p): shared by BCE and, for non-integer gamma,
        # by p**gamma, so pow() never lowers to a separate EUP chain.
        log_p_raw = jnp.log(p)
        if float(gamma).is_integer():
            p_pow = lax.integer_pow(p, int(gamma))      # pure VPU (p*p for 2)
        else:
            p_pow = jnp.exp(jnp.float32(gamma) * log_p_raw)

        weight = alpha * p_pow * (1.0 - lbl) + g * lbl

        # binary_cross_entropy(reduction='none') with torch's -100 log clamp.
        log_p = jnp.maximum(log_p_raw, -100.0)
        log_1mp = jnp.maximum(jnp.log(1.0 - p), -100.0)
        bce = -(g * log_p + (1.0 - g) * log_1mp)

        contrib = bce * weight  # (chunk_rows, 128)

        # Fold rows into a single (8,128) vreg: pure element-wise VPU adds
        # (reshape splits the sublane axis on an 8-row boundary -> free).
        return acc + jnp.sum(
            contrib.reshape(chunk_rows // _SUBLANE, _SUBLANE, _LANE), axis=0)

    acc = lax.fori_loop(0, n_chunks, chunk_body,
                        jnp.zeros((_SUBLANE, _LANE), jnp.float32),
                        unroll=True)
    out_ref[...] = acc


def varifocal_loss(pred_score, gt_score, label, alpha=0.75, gamma=2.0):
    """Pallas TPU implementation of VarifocalLoss.forward (returns f32 scalar).

    Inputs may be any floating dtype (f32/bf16) for pred/gt and any
    numeric/bool dtype for label; math is done in f32 in-kernel.
    """
    n = pred_score.size
    rows = pl.cdiv(n, _LANE)
    rows8 = pl.cdiv(rows, _SUBLANE) * _SUBLANE     # pad rows to sublane multiple
    n2d = rows8 * _LANE
    pad = n2d - n                                   # < 1024, only if n ragged

    if rows8 <= _CHUNK_ROWS:
        chunk_rows = rows8
        row_block = rows8
    else:
        chunk_rows = _CHUNK_ROWS
        row_block = min(_MAX_ROW_BLOCK, pl.cdiv(rows8, _CHUNK_ROWS) * _CHUNK_ROWS)
    num_blocks = pl.cdiv(rows8, row_block)
    # True when the grid overhangs the array; handled by in-kernel masking.
    needs_mask = num_blocks * row_block > rows8

    def prep(x):
        x = jnp.ravel(x)
        if pad:
            # Only to 8x128 granularity and only for ragged n.  Pad value 1
            # contributes exactly 0 (weight = 1, bce = 0).
            x = jnp.concatenate([x, jnp.full((pad,), 1, dtype=x.dtype)])
        return x.reshape(rows8, _LANE)

    pred2d = prep(pred_score)
    gt2d = prep(gt_score)
    label2d = prep(label)

    in_spec = pl.BlockSpec((row_block, _LANE), lambda i: (i, 0))
    out_spec = pl.BlockSpec((_SUBLANE, _LANE), lambda i: (i, 0))

    kernel = functools.partial(
        _vfl_kernel, alpha=float(alpha), gamma=float(gamma),
        row_block=row_block, chunk_rows=chunk_rows,
        rows_valid=rows8, needs_mask=needs_mask)

    partials = pl.pallas_call(
        kernel,
        out_shape=jax.ShapeDtypeStruct((num_blocks * _SUBLANE, _LANE), jnp.float32),
        grid_spec=pltpu.PrefetchScalarGridSpec(
            num_scalar_prefetch=0,
            grid=(num_blocks,),
            in_specs=[in_spec, in_spec, in_spec],
            out_specs=out_spec,
        ),
        compiler_params=pltpu.CompilerParams(
            # Independent per-block partial sums -> megacore-shardable.
            dimension_semantics=("parallel",),
            vmem_limit_bytes=_VMEM_LIMIT_BYTES,
        ),
    )(pred2d, gt2d, label2d)

    # Tiny final cross-lane reduction (num_blocks * 1024 f32) done by XLA.
    return jnp.sum(partials)


def _reference(pred_score, gt_score, label, alpha=0.75, gamma=2.0):
    p = pred_score.astype(jnp.float32)
    g = gt_score.astype(jnp.float32)
    lbl = label.astype(jnp.float32)
    weight = alpha * (p ** gamma) * (1.0 - lbl) + g * lbl
    bce = -(
        g * jnp.maximum(jnp.log(p), -100.0)
        + (1.0 - g) * jnp.maximum(jnp.log(1.0 - p), -100.0)
    )
    return jnp.sum(bce * weight)


def _make_inputs(key, shape):
    k1, k2, k3 = jax.random.split(key, 3)
    pred = jax.nn.sigmoid(jax.random.normal(k1, shape, jnp.float32))       # (0,1)
    gt = jax.random.uniform(k2, shape, jnp.float32)                        # [0,1]
    lbl = (jax.random.uniform(k3, shape, jnp.float32) > 0.5).astype(jnp.float32)
    return pred, gt, lbl


if __name__ == "__main__":
    key = jax.random.PRNGKey(0)

    # Primary shape (NCHW-style score maps); n = 2048 -> no padding, no mask.
    shapes = [
        (2, 4, 16, 16),   # n multiple of 1024: zero-copy path
        (3, 5, 23, 40),   # ragged n: small pad-to-(8x128) path
        (4, 3, 70, 80),   # rows8 > chunk, grid overhang: in-kernel mask path
    ]

    for idx, shape in enumerate(shapes):
        key, sub = jax.random.split(key)
        pred_score, gt_score, label = _make_inputs(sub, shape)
        loss = varifocal_loss(pred_score, gt_score, label)
        loss = jax.block_until_ready(loss)
        ref = _reference(pred_score, gt_score, label)
        assert jnp.allclose(loss, ref, rtol=1e-4, atol=1e-4), (shape, loss, ref)

    print("KERNEL_OK")
</pallas_src>

<mosaic_0001>
module attributes {stable_mosaic.version = 11 : i64} {
  func.func @_vfl_kernel(%arg0: i32, %arg1: memref<16x128xf32, #tpu.memory_space<vmem>>, %arg2: memref<16x128xf32, #tpu.memory_space<vmem>>, %arg3: memref<16x128xf32, #tpu.memory_space<vmem>>, %arg4: memref<8x128xf32, #tpu.memory_space<vmem>>) attributes {dimension_semantics = [#tpu.dimension_semantics<parallel>], iteration_bounds = array<i64: 1>, scalar_prefetch = 0 : i64, scratch_operands = 0 : i64, tpu.core_type = #tpu.core_type<tc>, window_params = [{transform_indices = @transform_0, window_bounds = array<i64: 16, 128>}, {transform_indices = @transform_1, window_bounds = array<i64: 16, 128>}, {transform_indices = @transform_2, window_bounds = array<i64: 16, 128>}, {transform_indices = @transform_3, window_bounds = array<i64: 8, 128>}]} {
    %cst = arith.constant 0.000000e+00 : f32
    %0 = vector.broadcast %cst : f32 to vector<8x128xf32>
    %c0_i32 = arith.constant 0 : i32
    %c16_i32 = arith.constant 16 : i32
    %1 = arith.muli %c0_i32, %c16_i32 : i32
    %2 = tpu.assume_multiple %1, 8 : i32
    %3 = arith.index_cast %2 : i32 to index
    %c0 = arith.constant 0 : index
    %4 = vector.load %arg1[%3, %c0] : memref<16x128xf32, #tpu.memory_space<vmem>>, vector<16x128xf32>
    %5 = arith.index_cast %2 : i32 to index
    %c0_0 = arith.constant 0 : index
    %6 = vector.load %arg2[%5, %c0_0] : memref<16x128xf32, #tpu.memory_space<vmem>>, vector<16x128xf32>
    %7 = arith.index_cast %2 : i32 to index
    %c0_1 = arith.constant 0 : index
    %8 = vector.load %arg3[%7, %c0_1] : memref<16x128xf32, #tpu.memory_space<vmem>>, vector<16x128xf32>
    %9 = math.log %4 : vector<16x128xf32>
    %10 = arith.mulf %4, %4 : vector<16x128xf32>
    %cst_2 = arith.constant 7.500000e-01 : f32
    %11 = vector.broadcast %cst_2 : f32 to vector<16x128xf32>
    %12 = arith.mulf %11, %10 : vector<16x128xf32>
    %cst_3 = arith.constant 1.000000e+00 : f32
    %13 = vector.broadcast %cst_3 : f32 to vector<16x128xf32>
    %14 = arith.subf %13, %8 : vector<16x128xf32>
    %15 = arith.mulf %12, %14 : vector<16x128xf32>
    %16 = arith.mulf %6, %8 : vector<16x128xf32>
    %17 = arith.addf %15, %16 : vector<16x128xf32>
    %cst_4 = arith.constant -1.000000e+02 : f32
    %18 = vector.broadcast %cst_4 : f32 to vector<16x128xf32>
    %19 = arith.maximumf %9, %18 : vector<16x128xf32>
    %cst_5 = arith.constant 1.000000e+00 : f32
    %20 = vector.broadcast %cst_5 : f32 to vector<16x128xf32>
    %21 = arith.subf %20, %4 : vector<16x128xf32>
    %22 = math.log %21 : vector<16x128xf32>
    %cst_6 = arith.constant -1.000000e+02 : f32
    %23 = vector.broadcast %cst_6 : f32 to vector<16x128xf32>
    %24 = arith.maximumf %22, %23 : vector<16x128xf32>
    %25 = arith.mulf %6, %19 : vector<16x128xf32>
    %cst_7 = arith.constant 1.000000e+00 : f32
    %26 = vector.broadcast %cst_7 : f32 to vector<16x128xf32>
    %27 = arith.subf %26, %6 : vector<16x128xf32>
    %28 = arith.mulf %27, %24 : vector<16x128xf32>
    %29 = arith.addf %25, %28 : vector<16x128xf32>
    %cst_8 = arith.constant 0.000000e+00 : f32
    %30 = vector.broadcast %cst_8 : f32 to vector<16x128xf32>
    %31 = arith.subf %30, %29 : vector<16x128xf32>
    %32 = arith.mulf %31, %17 : vector<16x128xf32>
    %33 = vector.shape_cast %32 : vector<16x128xf32> to vector<2x8x128xf32>
    %cst_9 = arith.constant dense<0.000000e+00> : vector<8x128xf32>
    %34 = vector.multi_reduction <add>, %33, %cst_9 [0] : vector<2x8x128xf32> to vector<8x128xf32>
    %35 = arith.addf %0, %34 : vector<8x128xf32>
    %c1_i32 = arith.constant 1 : i32
    %c0_10 = arith.constant 0 : index
    %c0_11 = arith.constant 0 : index
    %36 = vector.load %arg4[%c0_10, %c0_11] : memref<8x128xf32, #tpu.memory_space<vmem>>, vector<8x128xf32>
    tpu.vector_store %arg4[%c0_10, %c0_11], %35 {strides = array<i32>} : memref<8x128xf32, #tpu.memory_space<vmem>>, vector<8x128xf32>,
    return
  }
  func.func @transform_0(%arg0: i32) -> (i32, i32) {
    %c0_i32 = arith.constant 0 : i32
    %c0_i32_0 = arith.constant 0 : i32
    return %arg0, %c0_i32 : i32, i32
  }
  func.func @transform_1(%arg0: i32) -> (i32, i32) {
    %c0_i32 = arith.constant 0 : i32
    %c0_i32_0 = arith.constant 0 : i32
    return %arg0, %c0_i32 : i32, i32
  }
  func.func @transform_2(%arg0: i32) -> (i32, i32) {
    %c0_i32 = arith.constant 0 : i32
    %c0_i32_0 = arith.constant 0 : i32
    return %arg0, %c0_i32 : i32, i32
  }
  func.func @transform_3(%arg0: i32) -> (i32, i32) {
    %c0_i32 = arith.constant 0 : i32
    %c0_i32_0 = arith.constant 0 : i32
    return %arg0, %c0_i32 : i32, i32
  }
}

</mosaic_0001>

<bundles_post_ra>
// kernel: tpu_custom_call.1
= control target key start
LH: loop header
LB: loop body
LE: loop exit
PB: predicated region body
PF: predicated region fallthrough
CT: control target
= control target key end

     0   :  { %8 = vsyncpa [#allocation3], 0  ;;  %s257_s0 = inlined_call_operand.hbm [shape: f32[16,128], index: 0, kind: input, shape index: {}]   ;;  %s258_s1 = inlined_call_operand.hbm [shape: f32[16,128], index: 1, kind: input, shape index: {}]   ;;  %s259_s2 = inlined_call_operand.hbm [shape: f32[16,128], index: 2, kind: input, shape index: {}]   ;;  %s260_s3 = inlined_call_operand.hbm [shape: f32[8,128], index: 3, kind: output, shape index: {}]  }
   0x1   :  { %9 = vsyncpa [#allocation6], 0 }
   0x2   :  { %10 = vsyncpa [#allocation4], 0  ;;  %s219_s12 = smov [#allocation5]   ;;  %s220_s14 = smov [#allocation2]  }
   0x3   :  { %s28_s13 = sshll.u32 %s219_s12, 4  ;;  %s16_s15 = sshll.u32 %s220_s14, 4  ;;  %s29_s13 = int_to_ptr.vmem [resolvable:$true] %s28_s13  ;;  %s17_s15 = int_to_ptr.vmem [resolvable:$true] %s16_s15 }
   0x4   :  { %s141_s16 = scalar_lea.vmem %s29_s13, 256  ;;  %p146_p1 = scmp.lt.s32.totalorder %s29_s13, %s29_s13 }
   0x5   :  { %p142_p0 = scmp.ne.s32.totalorder %s29_s13, %s141_s16  ;;  %p147_p2 = scmp.lt.s32.totalorder %s141_s16, %s141_s16 }
   0x7   :  { %p148_p3 = por %p147_p2, %p146_p1 }
   0x9   :  { %p149_p4 = pnand %p148_p3, %p142_p0 }
   0xb   :  { %152 = shalt.err (!%p149_p4)
}
   0xc   :  { %s221_s17 = smov 128   ;;  %s222_s18 = smov 8  }
   0xd   :  { %34 = dma.hbm_to_vmem [thread:$0]  %s258_s1, 256, %s29_s13, [#allocation6], %s221_s17, %s221_s17, %s222_s18  }
   0xe   :  { %s161_s21 = scalar_lea.vmem %s17_s15, 256  ;;  %p166_p6 = scmp.lt.s32.totalorder %s17_s15, %s17_s15 }
   0xf   :  { %p162_p5 = scmp.ne.s32.totalorder %s17_s15, %s161_s21  ;;  %p167_p7 = scmp.lt.s32.totalorder %s161_s21, %s161_s21 }
  0x11   :  { %p168_p8 = por %p167_p7, %p166_p6 }
  0x13   :  { %p169_p9 = pnand %p168_p8, %p162_p5 }
  0x15   :  { %172 = shalt.err (!%p169_p9)
}
  0x16   :  { %22 = dma.hbm_to_vmem [thread:$0]  %s257_s0, 256, %s17_s15, [#allocation3], %s221_s17, %s221_s17, %s222_s18  }
  0x17   :  { %s223_s24 = smov [#allocation7]  }
  0x18   :  { %s40_s25 = sshll.u32 %s223_s24, 4  ;;  %s41_s25 = int_to_ptr.vmem [resolvable:$true] %s40_s25 }
  0x19   :  { %s181_s26 = scalar_lea.vmem %s41_s25, 256  ;;  %p186_p11 = scmp.lt.s32.totalorder %s41_s25, %s41_s25 }
  0x1a   :  { %p182_p10 = scmp.ne.s32.totalorder %s41_s25, %s181_s26  ;;  %p187_p12 = scmp.lt.s32.totalorder %s181_s26, %s181_s26 }
  0x1c   :  { %p188_p13 = por %p187_p12, %p186_p11 }
  0x1e   :  { %p189_p0 = pnand %p188_p13, %p182_p10 }
  0x20   :  { %192 = shalt.err (!%p189_p0)
}
  0x21   :  { %46 = dma.hbm_to_vmem [thread:$0]  %s259_s2, 256, %s41_s25, [#allocation6], %s221_s17, %s221_s17, %s222_s18  }
  0x22   :  { %213 = dma.done.wait [#allocation3], 256  }
  0x23   :  { %214 = vsyncadd [#allocation3], 4294967040 }
  0x24   :  { %215 = dma.done.wait [#allocation6], 512  }
  0x25   :  { %216 = vsyncadd [#allocation6], 4294966784  ;;  %v56_v0 = vld [vmem:[#allocation2] sm:$0xff]  ;;  %v57_v1 = vld [vmem:[#allocation2 + $0x8] sm:$0xff]  ;;  %s224_s0 = smov [#allocation8]  }
  0x26   :  { %125 = vlog2.f32 %v56_v0  ;;  %v80_v2 = vsub.f32 1.0, %v56_v0  ;;  %v81_v3 = vsub.f32 1.0, %v57_v1  ;;  %v66_v4 = vmul.f32 %v56_v0, %v56_v0  ;;  %v60_v5 = vld [vmem:[#allocation7] sm:$0xff]  ;;  %v61_v8 = vld [vmem:[#allocation7 + $0x8] sm:$0xff]  ;;  %v58_v10 = vld [vmem:[#allocation5] sm:$0xff]  ;;  %s109_s2 = sshll.u32 %s224_s0, 4  ;;  %s110_s2 = int_to_ptr.vmem [resolvable:$true] %s109_s2 }
  0x27   :  { %127 = vlog2.f32 %v57_v1  ;;  %v67_v6 = vmul.f32 %v57_v1, %v57_v1  ;;  %v59_v12 = vld [vmem:[#allocation5 + $0x8] sm:$0xff]  ;;  %v70_v15 = vsub.f32 1.0, %v60_v5  ;;  %v71_v18 = vsub.f32 1.0, %v61_v8  ;;  %s193_s28 = scalar_lea.vmem %s110_s2, 128  ;;  %p198_p2 = scmp.lt.s32.totalorder %s110_s2, %s110_s2 }
  0x28   :  { %129 = vlog2.f32 %v80_v2  ;;  %v68_v14 = vmul.f32 0.75, %v66_v4  ;;  %v90_v23 = vsub.f32 1.0, %v58_v10  ;;  %v91_v25 = vsub.f32 1.0, %v59_v12  ;;  %p194_p1 = scmp.ne.s32.totalorder %s110_s2, %s193_s28  ;;  %p199_p3 = scmp.lt.s32.totalorder %s193_s28, %s193_s28 }
  0x29   :  { %131 = vlog2.f32 %v81_v3  ;;  %v69_v17 = vmul.f32 0.75, %v67_v6  ;;  %v74_v27 = vmul.f32 %v60_v5, %v58_v10  ;;  %v75_v31 = vmul.f32 %v61_v8, %v59_v12 }
  0x2a   :  { %v72_v26 = vmul.f32 %v70_v15, %v68_v14  ;;  %p200_p4 = por %p199_p3, %p198_p2 }
  0x2b   :  { %v73_v30 = vmul.f32 %v71_v18, %v69_v17 }
  0x2c   :  { %v76_v36 = vadd.f32 %v74_v27, %v72_v26  ;;  %p201_p5 = pnand %p200_p4, %p194_p1 }
  0x2d   :  { %v77_v38 = vadd.f32 %v75_v31, %v73_v30 }
  0x33   :  { %v126_v7 = vpop.eup %125 }
  0x34   :  { %v128_v9 = vpop.eup %127  ;;  %v63_v11 = vmul.f32 0.6931472, %v126_v7 }
  0x35   :  { %v65_v13 = vmul.f32 0.6931472, %v128_v9  ;;  %v130_v16 = vpop.eup %129 }
  0x36   :  { %v78_v19 = vmax.f32 %v63_v11, -100.0  ;;  %v132_v20 = vpop.eup %131  ;;  %v83_v22 = vmul.f32 0.6931472, %v130_v16 }
  0x37   :  { %v79_v21 = vmax.f32 %v65_v13, -100.0  ;;  %v85_v24 = vmul.f32 0.6931472, %v132_v20 }
  0x38   :  { %v86_v28 = vmax.f32 %v83_v22, -100.0  ;;  %v88_v29 = vmul.f32 %v78_v19, %v58_v10 }
  0x39   :  { %v87_v32 = vmax.f32 %v85_v24, -100.0  ;;  %v89_v33 = vmul.f32 %v79_v21, %v59_v12 }
  0x3a   :  { %v92_v34 = vmul.f32 %v90_v23, %v86_v28 }
  0x3b   :  { %v93_v35 = vmul.f32 %v91_v25, %v87_v32 }
  0x3c   :  { %v94_v37 = vadd.f32 %v92_v34, %v88_v29 }
  0x3d   :  { %v95_v39 = vadd.f32 %v93_v35, %v89_v33 }
  0x3e   :  { %v96_v40 = vsub.f32 0.0, %v94_v37 }
  0x3f   :  { %v97_v41 = vsub.f32 0.0, %v95_v39 }
  0x40   :  { %v98_v42 = vmul.f32 %v96_v40, %v76_v36 }
  0x41   :  { %v99_v43 = vmul.f32 %v97_v41, %v77_v38 }
  0x43   :  { %v100_v44 = vadd.f32 %v99_v43, %v98_v42 }
  0x45   :  { %102 = vst [vmem:[#allocation8] sm:$0xff] %v100_v44 }
  0x46   :  { %204 = shalt.err (!%p201_p5)
}
  0x47   :  { %112 = dma.vmem_to_hbm [thread:$0]  %s110_s2, 128, %s260_s3, [#allocation4]  }
  0x48   :  { %217 = dma.done.wait [#allocation4], 128  }
  0x49   :  { %218 = vsyncadd [#allocation4], 4294967168 }
  0x4a   :  { %116 = vsyncpa [#allocation3], 1 }
  0x4b   :  { %117 = vsyncpa [#allocation6], 1 }
  0x4c   :  { %118 = vsyncpa [#allocation4], 1 }

</bundles_post_ra>
